<compile_context>
chip_gen: v5e
topology: v5e:2x2
jax: 0.10.0
libtpu: 0.0.40
codegen_flags: <defaults>
</compile_context>

<pallas_src>
import functools

import jax
import jax.numpy as jnp
from jax.experimental import pallas as pl
from jax.experimental.pallas import tpu as pltpu


def lstm_decode_kernel(embed_ref, h0_ref, c0_ref, w_ih_ref, w_hh_ref, b_ref,
                       w_dec_ref, b_dec_ref,
                       logits_ref, hN_ref, cN_ref,
                       xg_sc, hs_sc):
    """Whole-sequence LSTM + decode in a single invocation (no time grid).

    embed_ref : (S*Bp, E)  time-major, batch padded to Bp (multiple of 8)
    w_ih_ref  : (E, 4L)    gate columns reordered to [i, f, o, g]
    w_hh_ref  : (L, 4L)
    b_ref     : (1, 4L)    b_ih + b_hh (reordered)
    w_dec_ref : (L, V),  b_dec_ref : (1, V)
    xg_sc     : (S*Bp, 4L) scratch -- hoisted input projection
    hs_sc     : (S*Bp, L)  scratch -- per-step hidden states for deferred decode
    """
    Bp, L = h0_ref.shape
    S = embed_ref.shape[0] // Bp

    # Hoisted, time-independent input projection: one MXU matmul for all steps.
    xg_sc[...] = (jnp.dot(embed_ref[...], w_ih_ref[...],
                          preferred_element_type=jnp.float32)
                  + b_ref[...])

    w_hh = w_hh_ref[...]          # pinned in vregs across the recurrence

    def step(t, carry):
        h, c = carry
        off = pl.multiple_of(t * Bp, Bp)
        gates = xg_sc[pl.ds(off, Bp), :] + jnp.dot(
            h, w_hh, preferred_element_type=jnp.float32)
        # gate order [i, f, o, g]: one contiguous sigmoid range, one tanh range
        sig = jax.nn.sigmoid(gates[:, :3 * L])
        i_g = sig[:, 0 * L:1 * L]
        f_g = sig[:, 1 * L:2 * L]
        o_g = sig[:, 2 * L:3 * L]
        g_g = jnp.tanh(gates[:, 3 * L:])
        c_new = f_g * c + i_g * g_g
        h_new = o_g * jnp.tanh(c_new)
        hs_sc[pl.ds(off, Bp), :] = h_new
        return (h_new, c_new)

    hN, cN = jax.lax.fori_loop(0, S, step, (h0_ref[...], c0_ref[...]),
                               unroll=True)

    # Deferred decode: single (S*Bp, L) @ (L, V) matmul + bias, one slab store.
    logits_ref[...] = (jnp.dot(hs_sc[...], w_dec_ref[...],
                               preferred_element_type=jnp.float32)
                       + b_dec_ref[...]).astype(logits_ref.dtype)
    hN_ref[...] = hN
    cN_ref[...] = cN


def rnn_forward(x, prev_state, params):
    """x: (batch, seq) int32 token ids; prev_state: ((1,B,L), (1,B,L))."""
    emb_table, w_ih, w_hh, b_ih, b_hh, w_dec, b_dec = params
    B, S = x.shape
    E = emb_table.shape[1]
    L = w_hh.shape[1]            # torch w_hh: (4L, L)
    V = w_dec.shape[0]           # torch w_dec: (V, L)

    # Embedding gather + eval-mode dropout (identity): XLA glue in the wrapper.
    embed = jnp.take(emb_table, x, axis=0)                # (B, S, E)

    # Pad batch (sublane) dim to a multiple of 8; padded rows are zeros.
    Bp = ((B + 7) // 8) * 8
    pad = Bp - B
    embed_p = jnp.pad(embed, ((0, pad), (0, 0), (0, 0)))  # (Bp, S, E)
    h0 = jnp.pad(prev_state[0][0], ((0, pad), (0, 0)))    # (Bp, L)
    c0 = jnp.pad(prev_state[1][0], ((0, pad), (0, 0)))

    # Time-major flattened slab: row t*Bp + b holds (time t, batch b).
    embed_tm = jnp.transpose(embed_p, (1, 0, 2)).reshape(S * Bp, E)

    # Reorder gates from PyTorch [i, f, g, o] to [i, f, o, g].
    def reorder(w):
        return jnp.concatenate(
            [w[0 * L:1 * L], w[1 * L:2 * L], w[3 * L:4 * L], w[2 * L:3 * L]],
            axis=0)

    w_ih_t = reorder(w_ih).T                              # (E, 4L)
    w_hh_t = reorder(w_hh).T                              # (L, 4L)
    b_all = reorder(b_ih + b_hh).reshape(1, 4 * L)        # (1, 4L)
    w_dec_t = w_dec.T                                     # (L, V)
    b_dec2 = b_dec.reshape(1, V)                          # (1, V)

    vmem = pl.BlockSpec(memory_space=pltpu.MemorySpace.VMEM)
    logits_flat, hN, cN = pl.pallas_call(
        lstm_decode_kernel,
        out_shape=(
            jax.ShapeDtypeStruct((S * Bp, V), jnp.float32),
            jax.ShapeDtypeStruct((Bp, L), jnp.float32),
            jax.ShapeDtypeStruct((Bp, L), jnp.float32),
        ),
        in_specs=[vmem] * 8,
        out_specs=(vmem, vmem, vmem),
        scratch_shapes=[
            pltpu.VMEM((S * Bp, 4 * L), jnp.float32),     # hoisted x-projection
            pltpu.VMEM((S * Bp, L), jnp.float32),         # per-step hidden states
        ],
        compiler_params=pltpu.CompilerParams(
            vmem_limit_bytes=16 * 1024 * 1024),
    )(embed_tm, h0, c0, w_ih_t, w_hh_t, b_all, w_dec_t, b_dec2)

    logits = jnp.transpose(logits_flat.reshape(S, Bp, V)[:, :B, :], (1, 0, 2))
    state = (hN[:B][None], cN[:B][None])                  # (1, B, L) each
    # NOTE: torch also computes F.log_softmax(logits[0], dim=1) into a local
    # `preds` that is never returned; it is intentionally omitted (dead code).
    return logits, state


def rnn_forward_ref(x, prev_state, params):
    """Pure-JAX reference (lax.scan) for correctness checking."""
    emb_table, w_ih, w_hh, b_ih, b_hh, w_dec, b_dec = params
    L = w_hh.shape[1]
    embed = jnp.take(emb_table, x, axis=0)                # (B, S, E)
    h0 = prev_state[0][0]
    c0 = prev_state[1][0]

    def step(carry, x_t):
        h, c = carry
        gates = x_t @ w_ih.T + b_ih + h @ w_hh.T + b_hh
        i = jax.nn.sigmoid(gates[:, 0 * L:1 * L])
        f = jax.nn.sigmoid(gates[:, 1 * L:2 * L])
        g = jnp.tanh(gates[:, 2 * L:3 * L])
        o = jax.nn.sigmoid(gates[:, 3 * L:4 * L])
        c = f * c + i * g
        h = o * jnp.tanh(c)
        return (h, c), h

    (hN, cN), hs = jax.lax.scan(step, (h0, c0), jnp.transpose(embed, (1, 0, 2)))
    out = jnp.transpose(hs, (1, 0, 2))                    # (B, S, L)
    logits = out @ w_dec.T + b_dec
    return logits, (hN[None], cN[None])


if __name__ == "__main__":
    # Module hyperparameters (small, consistent with the torch module).
    n_vocab, seq_size, embedding_size, lstm_size, dropout = 64, 8, 16, 32, 0.5
    batch = 2

    key = jax.random.PRNGKey(0)
    ks = jax.random.split(key, 8)
    s = 0.1
    params = (
        s * jax.random.normal(ks[0], (n_vocab, embedding_size), jnp.float32),        # embedding
        s * jax.random.normal(ks[1], (4 * lstm_size, embedding_size), jnp.float32),  # w_ih
        s * jax.random.normal(ks[2], (4 * lstm_size, lstm_size), jnp.float32),       # w_hh
        s * jax.random.normal(ks[3], (4 * lstm_size,), jnp.float32),                 # b_ih
        s * jax.random.normal(ks[4], (4 * lstm_size,), jnp.float32),                 # b_hh
        s * jax.random.normal(ks[5], (n_vocab, lstm_size), jnp.float32),             # decode W
        s * jax.random.normal(ks[6], (n_vocab,), jnp.float32),                       # decode b
    )

    x = jax.random.randint(ks[7], (batch, seq_size), 0, n_vocab, dtype=jnp.int32)
    prev_state = (jnp.zeros((1, batch, lstm_size), jnp.float32),
                  jnp.zeros((1, batch, lstm_size), jnp.float32))

    logits, (hN, cN) = jax.jit(functools.partial(rnn_forward, params=params))(x, prev_state)
    jax.block_until_ready((logits, hN, cN))

    logits_ref, (hN_ref, cN_ref) = rnn_forward_ref(x, prev_state, params)
    assert logits.shape == (batch, seq_size, n_vocab)
    assert hN.shape == (1, batch, lstm_size) and cN.shape == (1, batch, lstm_size)
    assert jnp.allclose(logits, logits_ref, atol=1e-5, rtol=1e-5)
    assert jnp.allclose(hN, hN_ref, atol=1e-5, rtol=1e-5)
    assert jnp.allclose(cN, cN_ref, atol=1e-5, rtol=1e-5)

    print("KERNEL_OK")
</pallas_src>

<mosaic_0001>
module attributes {stable_mosaic.version = 11 : i64} {
  func.func @lstm_decode_kernel(%arg0: memref<64x16xf32, #tpu.memory_space<vmem>>, %arg1: memref<8x32xf32, #tpu.memory_space<vmem>>, %arg2: memref<8x32xf32, #tpu.memory_space<vmem>>, %arg3: memref<16x128xf32, #tpu.memory_space<vmem>>, %arg4: memref<32x128xf32, #tpu.memory_space<vmem>>, %arg5: memref<1x128xf32, #tpu.memory_space<vmem>>, %arg6: memref<32x64xf32, #tpu.memory_space<vmem>>, %arg7: memref<1x64xf32, #tpu.memory_space<vmem>>, %arg8: memref<64x64xf32, #tpu.memory_space<vmem>>, %arg9: memref<8x32xf32, #tpu.memory_space<vmem>>, %arg10: memref<8x32xf32, #tpu.memory_space<vmem>>, %arg11: memref<64x128xf32, #tpu.memory_space<vmem>>, %arg12: memref<64x32xf32, #tpu.memory_space<vmem>>) attributes {dimension_semantics = [], scalar_prefetch = 0 : i64, scratch_operands = 2 : i64, tpu.core_type = #tpu.core_type<tc>} {
    %c0 = arith.constant 0 : index
    %c0_0 = arith.constant 0 : index
    %0 = vector.load %arg0[%c0, %c0_0] : memref<64x16xf32, #tpu.memory_space<vmem>>, vector<64x16xf32>
    %c0_1 = arith.constant 0 : index
    %c0_2 = arith.constant 0 : index
    %1 = vector.load %arg3[%c0_1, %c0_2] : memref<16x128xf32, #tpu.memory_space<vmem>>, vector<16x128xf32>
    %cst = arith.constant dense<0.000000e+00> : vector<64x128xf32>
    %2 = tpu.matmul %0, %1, %cst {dimension_numbers = #tpu.dot_dimension_numbers<[1], [0], [0], [1], [0, 0, 1, 1], [], []>} : vector<64x16xf32>, vector<16x128xf32>, vector<64x128xf32> -> vector<64x128xf32>
    %c0_3 = arith.constant 0 : index
    %c0_4 = arith.constant 0 : index
    %3 = vector.load %arg5[%c0_3, %c0_4] : memref<1x128xf32, #tpu.memory_space<vmem>>, vector<1x128xf32>
    %4 = vector.broadcast %3 : vector<1x128xf32> to vector<64x128xf32>
    %5 = arith.addf %2, %4 : vector<64x128xf32>
    %c0_5 = arith.constant 0 : index
    %c0_6 = arith.constant 0 : index
    %6 = vector.load %arg11[%c0_5, %c0_6] : memref<64x128xf32, #tpu.memory_space<vmem>>, vector<64x128xf32>
    tpu.vector_store %arg11[%c0_5, %c0_6], %5 {strides = array<i32>} : memref<64x128xf32, #tpu.memory_space<vmem>>, vector<64x128xf32>,
    %c0_7 = arith.constant 0 : index
    %c0_8 = arith.constant 0 : index
    %7 = vector.load %arg4[%c0_7, %c0_8] : memref<32x128xf32, #tpu.memory_space<vmem>>, vector<32x128xf32>
    %c0_9 = arith.constant 0 : index
    %c0_10 = arith.constant 0 : index
    %8 = vector.load %arg1[%c0_9, %c0_10] : memref<8x32xf32, #tpu.memory_space<vmem>>, vector<8x32xf32>
    %c0_11 = arith.constant 0 : index
    %c0_12 = arith.constant 0 : index
    %9 = vector.load %arg2[%c0_11, %c0_12] : memref<8x32xf32, #tpu.memory_space<vmem>>, vector<8x32xf32>
    %c0_i32 = arith.constant 0 : i32
    %c8_i32 = arith.constant 8 : i32
    %10 = arith.muli %c0_i32, %c8_i32 : i32
    %11 = tpu.assume_multiple %10, 8 : i32
    %12 = arith.index_cast %11 : i32 to index
    %c0_13 = arith.constant 0 : index
    %13 = vector.load %arg11[%12, %c0_13] : memref<64x128xf32, #tpu.memory_space<vmem>>, vector<8x128xf32>
    %cst_14 = arith.constant dense<0.000000e+00> : vector<8x128xf32>
    %14 = tpu.matmul %8, %7, %cst_14 {dimension_numbers = #tpu.dot_dimension_numbers<[1], [0], [0], [1], [0, 0, 1, 1], [], []>} : vector<8x32xf32>, vector<32x128xf32>, vector<8x128xf32> -> vector<8x128xf32>
    %15 = arith.addf %13, %14 : vector<8x128xf32>
    %16 = vector.extract_strided_slice %15 {offsets = [0, 0], sizes = [8, 96], strides = [1, 1]} : vector<8x128xf32> to vector<8x96xf32>
    %17 = arith.negf %16 : vector<8x96xf32>
    %18 = math.exp %17 : vector<8x96xf32>
    %cst_15 = arith.constant 1.000000e+00 : f32
    %19 = vector.broadcast %cst_15 : f32 to vector<8x96xf32>
    %20 = arith.addf %19, %18 : vector<8x96xf32>
    %21 = arith.divf %19, %20 : vector<8x96xf32>
    %22 = vector.extract_strided_slice %21 {offsets = [0, 0], sizes = [8, 32], strides = [1, 1]} : vector<8x96xf32> to vector<8x32xf32>
    %23 = vector.extract_strided_slice %21 {offsets = [0, 32], sizes = [8, 32], strides = [1, 1]} : vector<8x96xf32> to vector<8x32xf32>
    %24 = vector.extract_strided_slice %21 {offsets = [0, 64], sizes = [8, 32], strides = [1, 1]} : vector<8x96xf32> to vector<8x32xf32>
    %25 = vector.extract_strided_slice %15 {offsets = [0, 96], sizes = [8, 32], strides = [1, 1]} : vector<8x128xf32> to vector<8x32xf32>
    %26 = math.tanh %25 : vector<8x32xf32>
    %27 = arith.mulf %23, %9 : vector<8x32xf32>
    %28 = arith.mulf %22, %26 : vector<8x32xf32>
    %29 = arith.addf %27, %28 : vector<8x32xf32>
    %30 = math.tanh %29 : vector<8x32xf32>
    %31 = arith.mulf %24, %30 : vector<8x32xf32>
    %32 = arith.index_cast %11 : i32 to index
    %c0_16 = arith.constant 0 : index
    %33 = vector.load %arg12[%32, %c0_16] : memref<64x32xf32, #tpu.memory_space<vmem>>, vector<8x32xf32>
    tpu.vector_store %arg12[%32, %c0_16], %31 {strides = array<i32>} : memref<64x32xf32, #tpu.memory_space<vmem>>, vector<8x32xf32>,
    %c1_i32 = arith.constant 1 : i32
    %c8_i32_17 = arith.constant 8 : i32
    %34 = arith.muli %c1_i32, %c8_i32_17 : i32
    %35 = tpu.assume_multiple %34, 8 : i32
    %36 = arith.index_cast %35 : i32 to index
    %c0_18 = arith.constant 0 : index
    %37 = vector.load %arg11[%36, %c0_18] : memref<64x128xf32, #tpu.memory_space<vmem>>, vector<8x128xf32>
    %cst_19 = arith.constant dense<0.000000e+00> : vector<8x128xf32>
    %38 = tpu.matmul %31, %7, %cst_19 {dimension_numbers = #tpu.dot_dimension_numbers<[1], [0], [0], [1], [0, 0, 1, 1], [], []>} : vector<8x32xf32>, vector<32x128xf32>, vector<8x128xf32> -> vector<8x128xf32>
    %39 = arith.addf %37, %38 : vector<8x128xf32>
    %40 = vector.extract_strided_slice %39 {offsets = [0, 0], sizes = [8, 96], strides = [1, 1]} : vector<8x128xf32> to vector<8x96xf32>
    %41 = arith.negf %40 : vector<8x96xf32>
    %42 = math.exp %41 : vector<8x96xf32>
    %cst_20 = arith.constant 1.000000e+00 : f32
    %43 = vector.broadcast %cst_20 : f32 to vector<8x96xf32>
    %44 = arith.addf %43, %42 : vector<8x96xf32>
    %45 = arith.divf %43, %44 : vector<8x96xf32>
    %46 = vector.extract_strided_slice %45 {offsets = [0, 0], sizes = [8, 32], strides = [1, 1]} : vector<8x96xf32> to vector<8x32xf32>
    %47 = vector.extract_strided_slice %45 {offsets = [0, 32], sizes = [8, 32], strides = [1, 1]} : vector<8x96xf32> to vector<8x32xf32>
    %48 = vector.extract_strided_slice %45 {offsets = [0, 64], sizes = [8, 32], strides = [1, 1]} : vector<8x96xf32> to vector<8x32xf32>
    %49 = vector.extract_strided_slice %39 {offsets = [0, 96], sizes = [8, 32], strides = [1, 1]} : vector<8x128xf32> to vector<8x32xf32>
    %50 = math.tanh %49 : vector<8x32xf32>
    %51 = arith.mulf %47, %29 : vector<8x32xf32>
    %52 = arith.mulf %46, %50 : vector<8x32xf32>
    %53 = arith.addf %51, %52 : vector<8x32xf32>
    %54 = math.tanh %53 : vector<8x32xf32>
    %55 = arith.mulf %48, %54 : vector<8x32xf32>
    %56 = arith.index_cast %35 : i32 to index
    %c0_21 = arith.constant 0 : index
    %57 = vector.load %arg12[%56, %c0_21] : memref<64x32xf32, #tpu.memory_space<vmem>>, vector<8x32xf32>
    tpu.vector_store %arg12[%56, %c0_21], %55 {strides = array<i32>} : memref<64x32xf32, #tpu.memory_space<vmem>>, vector<8x32xf32>,
    %c2_i32 = arith.constant 2 : i32
    %c8_i32_22 = arith.constant 8 : i32
    %58 = arith.muli %c2_i32, %c8_i32_22 : i32
    %59 = tpu.assume_multiple %58, 8 : i32
    %60 = arith.index_cast %59 : i32 to index
    %c0_23 = arith.constant 0 : index
    %61 = vector.load %arg11[%60, %c0_23] : memref<64x128xf32, #tpu.memory_space<vmem>>, vector<8x128xf32>
    %cst_24 = arith.constant dense<0.000000e+00> : vector<8x128xf32>
    %62 = tpu.matmul %55, %7, %cst_24 {dimension_numbers = #tpu.dot_dimension_numbers<[1], [0], [0], [1], [0, 0, 1, 1], [], []>} : vector<8x32xf32>, vector<32x128xf32>, vector<8x128xf32> -> vector<8x128xf32>
    %63 = arith.addf %61, %62 : vector<8x128xf32>
    %64 = vector.extract_strided_slice %63 {offsets = [0, 0], sizes = [8, 96], strides = [1, 1]} : vector<8x128xf32> to vector<8x96xf32>
    %65 = arith.negf %64 : vector<8x96xf32>
    %66 = math.exp %65 : vector<8x96xf32>
    %cst_25 = arith.constant 1.000000e+00 : f32
    %67 = vector.broadcast %cst_25 : f32 to vector<8x96xf32>
    %68 = arith.addf %67, %66 : vector<8x96xf32>
    %69 = arith.divf %67, %68 : vector<8x96xf32>
    %70 = vector.extract_strided_slice %69 {offsets = [0, 0], sizes = [8, 32], strides = [1, 1]} : vector<8x96xf32> to vector<8x32xf32>
    %71 = vector.extract_strided_slice %69 {offsets = [0, 32], sizes = [8, 32], strides = [1, 1]} : vector<8x96xf32> to vector<8x32xf32>
    %72 = vector.extract_strided_slice %69 {offsets = [0, 64], sizes = [8, 32], strides = [1, 1]} : vector<8x96xf32> to vector<8x32xf32>
    %73 = vector.extract_strided_slice %63 {offsets = [0, 96], sizes = [8, 32], strides = [1, 1]} : vector<8x128xf32> to vector<8x32xf32>
    %74 = math.tanh %73 : vector<8x32xf32>
    %75 = arith.mulf %71, %53 : vector<8x32xf32>
    %76 = arith.mulf %70, %74 : vector<8x32xf32>
    %77 = arith.addf %75, %76 : vector<8x32xf32>
    %78 = math.tanh %77 : vector<8x32xf32>
    %79 = arith.mulf %72, %78 : vector<8x32xf32>
    %80 = arith.index_cast %59 : i32 to index
    %c0_26 = arith.constant 0 : index
    %81 = vector.load %arg12[%80, %c0_26] : memref<64x32xf32, #tpu.memory_space<vmem>>, vector<8x32xf32>
    tpu.vector_store %arg12[%80, %c0_26], %79 {strides = array<i32>} : memref<64x32xf32, #tpu.memory_space<vmem>>, vector<8x32xf32>,
    %c3_i32 = arith.constant 3 : i32
    %c8_i32_27 = arith.constant 8 : i32
    %82 = arith.muli %c3_i32, %c8_i32_27 : i32
    %83 = tpu.assume_multiple %82, 8 : i32
    %84 = arith.index_cast %83 : i32 to index
    %c0_28 = arith.constant 0 : index
    %85 = vector.load %arg11[%84, %c0_28] : memref<64x128xf32, #tpu.memory_space<vmem>>, vector<8x128xf32>
    %cst_29 = arith.constant dense<0.000000e+00> : vector<8x128xf32>
    %86 = tpu.matmul %79, %7, %cst_29 {dimension_numbers = #tpu.dot_dimension_numbers<[1], [0], [0], [1], [0, 0, 1, 1], [], []>} : vector<8x32xf32>, vector<32x128xf32>, vector<8x128xf32> -> vector<8x128xf32>
    %87 = arith.addf %85, %86 : vector<8x128xf32>
    %88 = vector.extract_strided_slice %87 {offsets = [0, 0], sizes = [8, 96], strides = [1, 1]} : vector<8x128xf32> to vector<8x96xf32>
    %89 = arith.negf %88 : vector<8x96xf32>
    %90 = math.exp %89 : vector<8x96xf32>
    %cst_30 = arith.constant 1.000000e+00 : f32
    %91 = vector.broadcast %cst_30 : f32 to vector<8x96xf32>
    %92 = arith.addf %91, %90 : vector<8x96xf32>
    %93 = arith.divf %91, %92 : vector<8x96xf32>
    %94 = vector.extract_strided_slice %93 {offsets = [0, 0], sizes = [8, 32], strides = [1, 1]} : vector<8x96xf32> to vector<8x32xf32>
    %95 = vector.extract_strided_slice %93 {offsets = [0, 32], sizes = [8, 32], strides = [1, 1]} : vector<8x96xf32> to vector<8x32xf32>
    %96 = vector.extract_strided_slice %93 {offsets = [0, 64], sizes = [8, 32], strides = [1, 1]} : vector<8x96xf32> to vector<8x32xf32>
    %97 = vector.extract_strided_slice %87 {offsets = [0, 96], sizes = [8, 32], strides = [1, 1]} : vector<8x128xf32> to vector<8x32xf32>
    %98 = math.tanh %97 : vector<8x32xf32>
    %99 = arith.mulf %95, %77 : vector<8x32xf32>
    %100 = arith.mulf %94, %98 : vector<8x32xf32>
    %101 = arith.addf %99, %100 : vector<8x32xf32>
    %102 = math.tanh %101 : vector<8x32xf32>
    %103 = arith.mulf %96, %102 : vector<8x32xf32>
    %104 = arith.index_cast %83 : i32 to index
    %c0_31 = arith.constant 0 : index
    %105 = vector.load %arg12[%104, %c0_31] : memref<64x32xf32, #tpu.memory_space<vmem>>, vector<8x32xf32>
    tpu.vector_store %arg12[%104, %c0_31], %103 {strides = array<i32>} : memref<64x32xf32, #tpu.memory_space<vmem>>, vector<8x32xf32>,
    %c4_i32 = arith.constant 4 : i32
    %c8_i32_32 = arith.constant 8 : i32
    %106 = arith.muli %c4_i32, %c8_i32_32 : i32
    %107 = tpu.assume_multiple %106, 8 : i32
    %108 = arith.index_cast %107 : i32 to index
    %c0_33 = arith.constant 0 : index
    %109 = vector.load %arg11[%108, %c0_33] : memref<64x128xf32, #tpu.memory_space<vmem>>, vector<8x128xf32>
    %cst_34 = arith.constant dense<0.000000e+00> : vector<8x128xf32>
    %110 = tpu.matmul %103, %7, %cst_34 {dimension_numbers = #tpu.dot_dimension_numbers<[1], [0], [0], [1], [0, 0, 1, 1], [], []>} : vector<8x32xf32>, vector<32x128xf32>, vector<8x128xf32> -> vector<8x128xf32>
    %111 = arith.addf %109, %110 : vector<8x128xf32>
    %112 = vector.extract_strided_slice %111 {offsets = [0, 0], sizes = [8, 96], strides = [1, 1]} : vector<8x128xf32> to vector<8x96xf32>
    %113 = arith.negf %112 : vector<8x96xf32>
    %114 = math.exp %113 : vector<8x96xf32>
    %cst_35 = arith.constant 1.000000e+00 : f32
    %115 = vector.broadcast %cst_35 : f32 to vector<8x96xf32>
    %116 = arith.addf %115, %114 : vector<8x96xf32>
    %117 = arith.divf %115, %116 : vector<8x96xf32>
    %118 = vector.extract_strided_slice %117 {offsets = [0, 0], sizes = [8, 32], strides = [1, 1]} : vector<8x96xf32> to vector<8x32xf32>
    %119 = vector.extract_strided_slice %117 {offsets = [0, 32], sizes = [8, 32], strides = [1, 1]} : vector<8x96xf32> to vector<8x32xf32>
    %120 = vector.extract_strided_slice %117 {offsets = [0, 64], sizes = [8, 32], strides = [1, 1]} : vector<8x96xf32> to vector<8x32xf32>
    %121 = vector.extract_strided_slice %111 {offsets = [0, 96], sizes = [8, 32], strides = [1, 1]} : vector<8x128xf32> to vector<8x32xf32>
    %122 = math.tanh %121 : vector<8x32xf32>
    %123 = arith.mulf %119, %101 : vector<8x32xf32>
    %124 = arith.mulf %118, %122 : vector<8x32xf32>
    %125 = arith.addf %123, %124 : vector<8x32xf32>
    %126 = math.tanh %125 : vector<8x32xf32>
    %127 = arith.mulf %120, %126 : vector<8x32xf32>
    %128 = arith.index_cast %107 : i32 to index
    %c0_36 = arith.constant 0 : index
    %129 = vector.load %arg12[%128, %c0_36] : memref<64x32xf32, #tpu.memory_space<vmem>>, vector<8x32xf32>
    tpu.vector_store %arg12[%128, %c0_36], %127 {strides = array<i32>} : memref<64x32xf32, #tpu.memory_space<vmem>>, vector<8x32xf32>,
    %c5_i32 = arith.constant 5 : i32
    %c8_i32_37 = arith.constant 8 : i32
    %130 = arith.muli %c5_i32, %c8_i32_37 : i32
    %131 = tpu.assume_multiple %130, 8 : i32
    %132 = arith.index_cast %131 : i32 to index
    %c0_38 = arith.constant 0 : index
    %133 = vector.load %arg11[%132, %c0_38] : memref<64x128xf32, #tpu.memory_space<vmem>>, vector<8x128xf32>
    %cst_39 = arith.constant dense<0.000000e+00> : vector<8x128xf32>
    %134 = tpu.matmul %127, %7, %cst_39 {dimension_numbers = #tpu.dot_dimension_numbers<[1], [0], [0], [1], [0, 0, 1, 1], [], []>} : vector<8x32xf32>, vector<32x128xf32>, vector<8x128xf32> -> vector<8x128xf32>
    %135 = arith.addf %133, %134 : vector<8x128xf32>
    %136 = vector.extract_strided_slice %135 {offsets = [0, 0], sizes = [8, 96], strides = [1, 1]} : vector<8x128xf32> to vector<8x96xf32>
    %137 = arith.negf %136 : vector<8x96xf32>
    %138 = math.exp %137 : vector<8x96xf32>
    %cst_40 = arith.constant 1.000000e+00 : f32
    %139 = vector.broadcast %cst_40 : f32 to vector<8x96xf32>
    %140 = arith.addf %139, %138 : vector<8x96xf32>
    %141 = arith.divf %139, %140 : vector<8x96xf32>
    %142 = vector.extract_strided_slice %141 {offsets = [0, 0], sizes = [8, 32], strides = [1, 1]} : vector<8x96xf32> to vector<8x32xf32>
    %143 = vector.extract_strided_slice %141 {offsets = [0, 32], sizes = [8, 32], strides = [1, 1]} : vector<8x96xf32> to vector<8x32xf32>
    %144 = vector.extract_strided_slice %141 {offsets = [0, 64], sizes = [8, 32], strides = [1, 1]} : vector<8x96xf32> to vector<8x32xf32>
    %145 = vector.extract_strided_slice %135 {offsets = [0, 96], sizes = [8, 32], strides = [1, 1]} : vector<8x128xf32> to vector<8x32xf32>
    %146 = math.tanh %145 : vector<8x32xf32>
    %147 = arith.mulf %143, %125 : vector<8x32xf32>
    %148 = arith.mulf %142, %146 : vector<8x32xf32>
    %149 = arith.addf %147, %148 : vector<8x32xf32>
    %150 = math.tanh %149 : vector<8x32xf32>
    %151 = arith.mulf %144, %150 : vector<8x32xf32>
    %152 = arith.index_cast %131 : i32 to index
    %c0_41 = arith.constant 0 : index
    %153 = vector.load %arg12[%152, %c0_41] : memref<64x32xf32, #tpu.memory_space<vmem>>, vector<8x32xf32>
    tpu.vector_store %arg12[%152, %c0_41], %151 {strides = array<i32>} : memref<64x32xf32, #tpu.memory_space<vmem>>, vector<8x32xf32>,
    %c6_i32 = arith.constant 6 : i32
    %c8_i32_42 = arith.constant 8 : i32
    %154 = arith.muli %c6_i32, %c8_i32_42 : i32
    %155 = tpu.assume_multiple %154, 8 : i32
    %156 = arith.index_cast %155 : i32 to index
    %c0_43 = arith.constant 0 : index
    %157 = vector.load %arg11[%156, %c0_43] : memref<64x128xf32, #tpu.memory_space<vmem>>, vector<8x128xf32>
    %cst_44 = arith.constant dense<0.000000e+00> : vector<8x128xf32>
    %158 = tpu.matmul %151, %7, %cst_44 {dimension_numbers = #tpu.dot_dimension_numbers<[1], [0], [0], [1], [0, 0, 1, 1], [], []>} : vector<8x32xf32>, vector<32x128xf32>, vector<8x128xf32> -> vector<8x128xf32>
    %159 = arith.addf %157, %158 : vector<8x128xf32>
    %160 = vector.extract_strided_slice %159 {offsets = [0, 0], sizes = [8, 96], strides = [1, 1]} : vector<8x128xf32> to vector<8x96xf32>
    %161 = arith.negf %160 : vector<8x96xf32>
    %162 = math.exp %161 : vector<8x96xf32>
    %cst_45 = arith.constant 1.000000e+00 : f32
    %163 = vector.broadcast %cst_45 : f32 to vector<8x96xf32>
    %164 = arith.addf %163, %162 : vector<8x96xf32>
    %165 = arith.divf %163, %164 : vector<8x96xf32>
    %166 = vector.extract_strided_slice %165 {offsets = [0, 0], sizes = [8, 32], strides = [1, 1]} : vector<8x96xf32> to vector<8x32xf32>
    %167 = vector.extract_strided_slice %165 {offsets = [0, 32], sizes = [8, 32], strides = [1, 1]} : vector<8x96xf32> to vector<8x32xf32>
    %168 = vector.extract_strided_slice %165 {offsets = [0, 64], sizes = [8, 32], strides = [1, 1]} : vector<8x96xf32> to vector<8x32xf32>
    %169 = vector.extract_strided_slice %159 {offsets = [0, 96], sizes = [8, 32], strides = [1, 1]} : vector<8x128xf32> to vector<8x32xf32>
    %170 = math.tanh %169 : vector<8x32xf32>
    %171 = arith.mulf %167, %149 : vector<8x32xf32>
    %172 = arith.mulf %166, %170 : vector<8x32xf32>
    %173 = arith.addf %171, %172 : vector<8x32xf32>
    %174 = math.tanh %173 : vector<8x32xf32>
    %175 = arith.mulf %168, %174 : vector<8x32xf32>
    %176 = arith.index_cast %155 : i32 to index
    %c0_46 = arith.constant 0 : index
    %177 = vector.load %arg12[%176, %c0_46] : memref<64x32xf32, #tpu.memory_space<vmem>>, vector<8x32xf32>
    tpu.vector_store %arg12[%176, %c0_46], %175 {strides = array<i32>} : memref<64x32xf32, #tpu.memory_space<vmem>>, vector<8x32xf32>,
    %c7_i32 = arith.constant 7 : i32
    %c8_i32_47 = arith.constant 8 : i32
    %178 = arith.muli %c7_i32, %c8_i32_47 : i32
    %179 = tpu.assume_multiple %178, 8 : i32
    %180 = arith.index_cast %179 : i32 to index
    %c0_48 = arith.constant 0 : index
    %181 = vector.load %arg11[%180, %c0_48] : memref<64x128xf32, #tpu.memory_space<vmem>>, vector<8x128xf32>
    %cst_49 = arith.constant dense<0.000000e+00> : vector<8x128xf32>
    %182 = tpu.matmul %175, %7, %cst_49 {dimension_numbers = #tpu.dot_dimension_numbers<[1], [0], [0], [1], [0, 0, 1, 1], [], []>} : vector<8x32xf32>, vector<32x128xf32>, vector<8x128xf32> -> vector<8x128xf32>
    %183 = arith.addf %181, %182 : vector<8x128xf32>
    %184 = vector.extract_strided_slice %183 {offsets = [0, 0], sizes = [8, 96], strides = [1, 1]} : vector<8x128xf32> to vector<8x96xf32>
    %185 = arith.negf %184 : vector<8x96xf32>
    %186 = math.exp %185 : vector<8x96xf32>
    %cst_50 = arith.constant 1.000000e+00 : f32
    %187 = vector.broadcast %cst_50 : f32 to vector<8x96xf32>
    %188 = arith.addf %187, %186 : vector<8x96xf32>
    %189 = arith.divf %187, %188 : vector<8x96xf32>
    %190 = vector.extract_strided_slice %189 {offsets = [0, 0], sizes = [8, 32], strides = [1, 1]} : vector<8x96xf32> to vector<8x32xf32>
    %191 = vector.extract_strided_slice %189 {offsets = [0, 32], sizes = [8, 32], strides = [1, 1]} : vector<8x96xf32> to vector<8x32xf32>
    %192 = vector.extract_strided_slice %189 {offsets = [0, 64], sizes = [8, 32], strides = [1, 1]} : vector<8x96xf32> to vector<8x32xf32>
    %193 = vector.extract_strided_slice %183 {offsets = [0, 96], sizes = [8, 32], strides = [1, 1]} : vector<8x128xf32> to vector<8x32xf32>
    %194 = math.tanh %193 : vector<8x32xf32>
    %195 = arith.mulf %191, %173 : vector<8x32xf32>
    %196 = arith.mulf %190, %194 : vector<8x32xf32>
    %197 = arith.addf %195, %196 : vector<8x32xf32>
    %198 = math.tanh %197 : vector<8x32xf32>
    %199 = arith.mulf %192, %198 : vector<8x32xf32>
    %200 = arith.index_cast %179 : i32 to index
    %c0_51 = arith.constant 0 : index
    %201 = vector.load %arg12[%200, %c0_51] : memref<64x32xf32, #tpu.memory_space<vmem>>, vector<8x32xf32>
    tpu.vector_store %arg12[%200, %c0_51], %199 {strides = array<i32>} : memref<64x32xf32, #tpu.memory_space<vmem>>, vector<8x32xf32>,
    %c8_i32_52 = arith.constant 8 : i32
    %c0_53 = arith.constant 0 : index
    %c0_54 = arith.constant 0 : index
    %202 = vector.load %arg12[%c0_53, %c0_54] : memref<64x32xf32, #tpu.memory_space<vmem>>, vector<64x32xf32>
    %c0_55 = arith.constant 0 : index
    %c0_56 = arith.constant 0 : index
    %203 = vector.load %arg6[%c0_55, %c0_56] : memref<32x64xf32, #tpu.memory_space<vmem>>, vector<32x64xf32>
    %cst_57 = arith.constant dense<0.000000e+00> : vector<64x64xf32>
    %204 = tpu.matmul %202, %203, %cst_57 {dimension_numbers = #tpu.dot_dimension_numbers<[1], [0], [0], [1], [0, 0, 1, 1], [], []>} : vector<64x32xf32>, vector<32x64xf32>, vector<64x64xf32> -> vector<64x64xf32>
    %c0_58 = arith.constant 0 : index
    %c0_59 = arith.constant 0 : index
    %205 = vector.load %arg7[%c0_58, %c0_59] : memref<1x64xf32, #tpu.memory_space<vmem>>, vector<1x64xf32>
    %206 = vector.broadcast %205 : vector<1x64xf32> to vector<64x64xf32>
    %207 = arith.addf %204, %206 : vector<64x64xf32>
    %c0_60 = arith.constant 0 : index
    %c0_61 = arith.constant 0 : index
    %208 = vector.load %arg8[%c0_60, %c0_61] : memref<64x64xf32, #tpu.memory_space<vmem>>, vector<64x64xf32>
    tpu.vector_store %arg8[%c0_60, %c0_61], %207 {strides = array<i32>} : memref<64x64xf32, #tpu.memory_space<vmem>>, vector<64x64xf32>,
    %c0_62 = arith.constant 0 : index
    %c0_63 = arith.constant 0 : index
    %209 = vector.load %arg9[%c0_62, %c0_63] : memref<8x32xf32, #tpu.memory_space<vmem>>, vector<8x32xf32>
    tpu.vector_store %arg9[%c0_62, %c0_63], %199 {strides = array<i32>} : memref<8x32xf32, #tpu.memory_space<vmem>>, vector<8x32xf32>,
    %c0_64 = arith.constant 0 : index
    %c0_65 = arith.constant 0 : index
    %210 = vector.load %arg10[%c0_64, %c0_65] : memref<8x32xf32, #tpu.memory_space<vmem>>, vector<8x32xf32>
    tpu.vector_store %arg10[%c0_64, %c0_65], %197 {strides = array<i32>} : memref<8x32xf32, #tpu.memory_space<vmem>>, vector<8x32xf32>,
    return
  }
}

</mosaic_0001>

<bundles_post_ra>
// kernel: rnn_forward.1
= control target key start
LH: loop header
LB: loop body
LE: loop exit
PB: predicated region body
PF: predicated region fallthrough
CT: control target
= control target key end

     0   :  { %vm46_vm0 = vcmask 130048   ;;  %vm127_vm1 = vcmask 261120   ;;  %s889_s30 = smov 32   ;;  %s891_s22 = smov 96   ;;  %s1189_s3 = inlined_call_operand.vmem [shape: f32[16,128], index: 3, kind: input, shape index: {}]   ;;  %s1190_s0 = inlined_call_operand.vmem [shape: f32[64,16], index: 0, kind: input, shape index: {}]   ;;  %s1191_s4 = inlined_call_operand.vmem [shape: f32[32,128], index: 4, kind: input, shape index: {}]   ;;  %s1192_s5 = inlined_call_operand.vmem [shape: f32[1,128], index: 5, kind: input, shape index: {}]   ;;  %s1193_s1 = inlined_call_operand.vmem [shape: f32[8,32], index: 1, kind: input, shape index: {}]   ;;  %s1194_s2 = inlined_call_operand.vmem [shape: f32[8,32], index: 2, kind: input, shape index: {}]   ;;  %s1195_s6 = inlined_call_operand.vmem [shape: f32[32,64], index: 6, kind: input, shape index: {}]   ;;  %s1196_s7 = inlined_call_operand.vmem [shape: f32[1,64], index: 7, kind: input, shape index: {}]   ;;  %s1197_s8 = inlined_call_operand.vmem [shape: f32[64,64], index: 8, kind: output, shape index: {0}]   ;;  %s1198_s10 = inlined_call_operand.vmem [shape: f32[8,32], index: 10, kind: output, shape index: {2}]   ;;  %s1199_s9 = inlined_call_operand.vmem [shape: f32[8,32], index: 9, kind: output, shape index: {1}]  }
   0x1   :  { %v41_v0 = vld [vmem:[%s1189_s3 + $0x8] sm:$0xff]  ;;  %v40_v1 = vld [vmem:[%s1189_s3] sm:$0xff]  ;;  %v39_v2 = vld [vmem:[%s1190_s0 + $0x38] sm:$0xff] }
   0x2   :  { %814 = vmatpush.msra.mxu2 %v41_v0  ;;  %v959_v3 = vld [vmem:[%s1191_s4 + $0x18] sm:$0xff]  ;;  %85 = vmatpush.msra.mxu0 %v41_v0  ;;  %v32_v4 = vld [vmem:[%s1190_s0] sm:$0xff]  ;;  %v970_v5 = vld [vmem:[%s1191_s4 + $0x10] sm:$0xff] }
   0x3   :  { %282 = vmatpush.msra.mxu3 %v959_v3  ;;  %350 = vmatpush.msra.mxu1 %v959_v3  ;;  %v978_v6 = vld [vmem:[%s1191_s4 + $0x8] sm:$0xff]  ;;  %v986_v7 = vld [vmem:[%s1191_s4] sm:$0xff] }
   0x4   :  { %815 = vmatpush.msra.mxu2 %v40_v1  ;;  %86 = vmatpush.msra.mxu0 %v40_v1  ;;  %v124_v8 = vld [vmem:[%s1193_s1] sm:$0xff]  ;;  %v33_v39 = vld [vmem:[%s1190_s0 + $0x8] sm:$0xff] }
   0x5   :  { %789 = vmatmul.msk.f32.vlgmr.msra.gmra.mxu2 %vm46_vm0, %v39_v2  ;;  %782 = vmatmul.msk.f32.vlgmr.msra.gmra.mxu0 %vm46_vm0, %v32_v4  ;;  %v1018_v11 = vld [vmem:[%s1192_s5] ss:$0 sm:$0xff] }
   0x6   :  { %143 = vmatpush.msrb.mxu2 %v959_v3  ;;  %283 = vmatpush.msra.mxu3 %v970_v5  ;;  %v125_v16 = vld [vmem:[%s1194_s2] sm:$0xff]  ;;  %s890_s2 = smov 64  }
   0x7   :  { %351 = vmatpush.msra.mxu1 %v970_v5 }
   0x8   :  { %144 = vmatpush.msrb.mxu2 %v970_v5  ;;  %284 = vmatpush.msra.mxu3 %v978_v6 }
   0x9   :  { %352 = vmatpush.msra.mxu1 %v978_v6 }
   0xa   :  { %145 = vmatpush.msrb.mxu2 %v978_v6  ;;  %285 = vmatpush.msra.mxu3 %v986_v7 }
   0xb   :  { %353 = vmatpush.msra.mxu1 %v986_v7 }
   0xc   :  { %486 = vmatpush.msrb.mxu3 %v959_v3  ;;  %146 = vmatpush.msrb.mxu2 %v986_v7 }
   0xd   :  { %554 = vmatpush.msrb.mxu1 %v959_v3  ;;  %790 = vmatmul.msk.f32.vlgmr.msrb.gmra.mxu2 %vm127_vm1, %v124_v8 }
   0xe   :  { %487 = vmatpush.msrb.mxu3 %v970_v5  ;;  %214 = vmatpush.msra.mxu2 %v959_v3 }
   0xf   :  { %555 = vmatpush.msrb.mxu1 %v970_v5  ;;  %783 = vmatmul.msk.f32.gmra.mxu0 %vm46_vm0, %v33_v39 }
  0x10   :  { %488 = vmatpush.msrb.mxu3 %v978_v6  ;;  %215 = vmatpush.msra.mxu2 %v970_v5 }
  0x11   :  { %556 = vmatpush.msrb.mxu1 %v978_v6 }
  0x12   :  { %489 = vmatpush.msrb.mxu3 %v986_v7  ;;  %216 = vmatpush.msra.mxu2 %v978_v6 }
  0x13   :  { %557 = vmatpush.msrb.mxu1 %v986_v7 }
  0x14   :  { %217 = vmatpush.msra.mxu2 %v986_v7 }
  0x16   :  { %418 = vmatpush.msrb.mxu2 %v959_v3 }
  0x18   :  { %419 = vmatpush.msrb.mxu2 %v970_v5 }
  0x1a   :  { %420 = vmatpush.msrb.mxu2 %v978_v6 }
  0x1c   :  { %421 = vmatpush.msrb.mxu2 %v986_v7 }
  0x82   :  { %v88_v10 = vpop.f32.mrf.mxu0 }
  0x83   :  { %v89_v12 = vadd.f32 %v1018_v11, %v88_v10 }
  0x88   :  { %v1013_v9 = vpop.f32.mrf.mxu2 }
  0x8c   :  { %v91_v41 = vpop.f32.mrf.mxu0 }
  0x8d   :  { %v92_v42 = vadd.f32 %v1018_v11, %v91_v41 }
  0x90   :  { %v148_v13 = vpop.f32.mrf.mxu2 }
  0x91   :  { %v151_v14 = vadd.f32 %v148_v13, %v89_v12 }
  0x93   :  { %825 = vtanh.f32 %v151_v14  ;;  %v791_v17 = vmul.f32 -1.442695, %v151_v14 }
  0x95   :  { %827 = vpow2.f32 %v791_v17 }
  0x99   :  { %v826_v15 = vpop.eup %825 }
  0x9a   :  { %178 = vrot.lane.b32.xlu0 %v826_v15, %s889_s30 }
  0x9b   :  { %v828_v18 = vpop.eup %827 }
  0x9c   :  { %v155_v19 = vadd.f32 1.0, %v828_v18 }
  0x9e   :  { %829 = vrcp.f32 %v155_v19  ;;  %v167_v25 = vand.u32 2147483648, %v155_v19  ;;  %vm161_vm3 = vweird.f32 %v155_v19  ;;  %v165_v26 = vand.u32 2147483647, %v155_v19 }
  0xa0   :  { %v168_v28 = vor.u32 1.1754944e-38, %v167_v25  ;;  %vm166_vm5 = vcmp.eq.f32.partialorder %v165_v26, 8.507059e+37 }
  0xa2   :  { %173 = vrot.lane.b32.xlu0 %v125_v16, %s889_s30 }
  0xa4   :  { %v830_v20 = vpop.eup %829 }
  0xa5   :  { %v157_v21 = vmul.f32 %v830_v20, %v155_v19  ;;  %vm162_vm2 = vweird.f32 %v830_v20 }
  0xa6   :  { %vm163_vm4 = vmor %vm161_vm3, %vm162_vm2 }
  0xa7   :  { %v158_v22 = vsub.f32 1.0, %v157_v21 }
  0xa9   :  { %v159_v23 = vmul.f32 %v830_v20, %v158_v22 }
  0xab   :  { %v160_v24 = vadd.f32 %v830_v20, %v159_v23 }
  0xad   :  { %v164_v27 = vsel %vm163_vm4, %v830_v20, %v160_v24 }
  0xae   :  { %v169_v30 = vsel %vm166_vm5, %v168_v28, %v164_v27 }
 0x10c   :  { %v179_v29 = vpop.permute.xlu0 %178 }
 0x10d   :  { %v181_v31 = vmul.f32 %v179_v29, %v169_v30 }
 0x10f   :  { %183 = vrot.lane.b32.xlu1 %v181_v31, %s889_s30  ;;  %v35_v31 = vld [vmem:[%s1190_s0 + $0x18] sm:$0xff] }
 0x114   :  { %v174_v32 = vpop.permute.xlu0 %173 }
 0x115   :  { %v176_v33 = vmul.f32 %v174_v32, %v169_v30 }
 0x181   :  { %v184_v34 = vpop.permute.xlu1 %183 }
 0x182   :  { %v186_v35 = vadd.f32 %v184_v34, %v176_v33 }
 0x184   :  { %831 = vtanh.f32 %v186_v35 }
 0x18a   :  { %v832_v36 = vpop.eup %831 }
 0x18b   :  { %189 = vrot.lane.b32.xlu1 %v832_v36, %s889_s30 }
 0x1fd   :  { %v190_v37 = vpop.permute.xlu1 %189 }
 0x1fe   :  { %v192_v38 = vmul.f32 %v190_v37, %v169_v30 }
 0x200   :  { %194 = vrot.lane.b32.xlu2 %v192_v38, %s890_s2 }
 0x25a   :  { %v195_v40 = vpop.permute.xlu2 %194 }
 0x25b   :  { %197 = vst.msk [vmem:[#allocation3] sm:$0xff] %vm127_vm1, %v195_v40  ;;  %792 = vmatmul.msk.f32.vlgmr.msra.gmra.mxu2 %vm127_vm1, %v195_v40 }
 0x25c   :  { %622 = vmatpush.msra.mxu2 %v959_v3  ;;  %v34_v3 = vld [vmem:[%s1190_s0 + $0x10] sm:$0xff] }
 0x25d   :  { %784 = vmatmul.msk.f32.gmra.mxu0 %vm46_vm0, %v34_v3 }
 0x25e   :  { %623 = vmatpush.msra.mxu2 %v970_v5 }
 0x260   :  { %624 = vmatpush.msra.mxu2 %v978_v6 }
 0x262   :  { %625 = vmatpush.msra.mxu2 %v986_v7 }
 0x265   :  { %785 = vmatmul.msk.f32.gmra.mxu0 %vm46_vm0, %v35_v31  ;;  %v682_v31 = vld [vmem:[%s1195_s6] sm:$0xff] }
 0x2da   :  { %v94_v5 = vpop.f32.mrf.mxu0 }
 0x2db   :  { %v95_v6 = vadd.f32 %v1018_v11, %v94_v5 }
 0x2de   :  { %v219_v43 = vpop.f32.mrf.mxu2 }
 0x2df   :  { %v222_v44 = vadd.f32 %v219_v43, %v92_v42 }
 0x2e1   :  { %833 = vtanh.f32 %v222_v44  ;;  %v793_v46 = vmul.f32 -1.442695, %v222_v44 }
 0x2e3   :  { %835 = vpow2.f32 %v793_v46 }
 0x2e7   :  { %v834_v45 = vpop.eup %833 }
 0x2e8   :  { %245 = vrot.lane.b32.xlu2 %v834_v45, %s889_s30 }
 0x2e9   :  { %v836_v47 = vpop.eup %835 }
 0x2ea   :  { %v226_v48 = vadd.f32 1.0, %v836_v47 }
 0x2ec   :  { %837 = vrcp.f32 %v226_v48  ;;  %v238_v54 = vand.u32 2147483648, %v226_v48  ;;  %vm232_vm7 = vweird.f32 %v226_v48  ;;  %v236_v55 = vand.u32 2147483647, %v226_v48 }
 0x2ee   :  { %v239_v57 = vor.u32 1.1754944e-38, %v238_v54  ;;  %vm237_vm9 = vcmp.eq.f32.partialorder %v236_v55, 8.507059e+37 }
 0x2f2   :  { %v838_v49 = vpop.eup %837 }
 0x2f3   :  { %v228_v50 = vmul.f32 %v838_v49, %v226_v48  ;;  %vm233_vm6 = vweird.f32 %v838_v49 }
 0x2f4   :  { %vm234_vm8 = vmor %vm232_vm7, %vm233_vm6 }
 0x2f5   :  { %v229_v51 = vsub.f32 1.0, %v228_v50 }
 0x2f7   :  { %v230_v52 = vmul.f32 %v838_v49, %v229_v51 }
 0x2f9   :  { %v231_v53 = vadd.f32 %v838_v49, %v230_v52 }
 0x2fb   :  { %v235_v56 = vsel %vm234_vm8, %v838_v49, %v231_v53  ;;  %vm755_vm8 = vcmask 523264  }
 0x2fc   :  { %v240_v59 = vsel %vm237_vm9, %v239_v57, %v235_v56 }
 0x2fd   :  { %v243_v61 = vmul.f32 %v240_v59, %v186_v35  ;;  %v97_v35 = vpop.f32.mrf.mxu0 }
 0x2fe   :  { %v98_v36 = vadd.f32 %v1018_v11, %v97_v35 }
 0x342   :  { %v246_v58 = vpop.permute.xlu2 %245 }
 0x343   :  { %v248_v60 = vmul.f32 %v246_v58, %v240_v59 }
 0x345   :  { %250 = vrot.lane.b32.xlu0 %v248_v60, %s889_s30 }
 0x3b7   :  { %v251_v62 = vpop.permute.xlu0 %250 }
 0x3b8   :  { %v253_v63 = vadd.f32 %v251_v62, %v243_v61  ;;  %v36_v61 = vld [vmem:[%s1190_s0 + $0x20] sm:$0xff] }
 0x3b9   :  { %786 = vmatmul.msk.f32.gmra.mxu0 %vm46_vm0, %v36_v61  ;;  %v38_v61 = vld [vmem:[%s1190_s0 + $0x30] sm:$0xff] }
 0x3ba   :  { %839 = vtanh.f32 %v253_v63 }
 0x3c0   :  { %v840_v0 = vpop.eup %839 }
 0x3c1   :  { %256 = vrot.lane.b32.xlu1 %v840_v0, %s889_s30 }
 0x433   :  { %v257_v1 = vpop.permute.xlu1 %256 }
 0x434   :  { %v259_v2 = vmul.f32 %v257_v1, %v240_v59 }
 0x436   :  { %261 = vrot.lane.b32.xlu2 %v259_v2, %s890_s2 }
 0x490   :  { %v262_v4 = vpop.permute.xlu2 %261 }
 0x491   :  { %265 = vst.msk [vmem:[#allocation3 + $0x8] sm:$0xff] %vm127_vm1, %v262_v4  ;;  %794 = vmatmul.msk.f32.vlgmr.msra.gmra.mxu3 %vm127_vm1, %v262_v4 }
 0x514   :  { %v287_v7 = vpop.f32.mrf.mxu3 }
 0x515   :  { %v290_v8 = vadd.f32 %v287_v7, %v95_v6 }
 0x517   :  { %841 = vtanh.f32 %v290_v8  ;;  %v795_v12 = vmul.f32 -1.442695, %v290_v8 }
 0x519   :  { %843 = vpow2.f32 %v795_v12 }
 0x51d   :  { %v842_v10 = vpop.eup %841 }
 0x51e   :  { %313 = vrot.lane.b32.xlu0 %v842_v10, %s889_s30 }
 0x51f   :  { %v844_v13 = vpop.eup %843 }
 0x520   :  { %v294_v14 = vadd.f32 1.0, %v844_v13 }
 0x522   :  { %845 = vrcp.f32 %v294_v14  ;;  %v306_v20 = vand.u32 2147483648, %v294_v14  ;;  %vm300_vm11 = vweird.f32 %v294_v14  ;;  %v304_v21 = vand.u32 2147483647, %v294_v14 }
 0x524   :  { %v307_v23 = vor.u32 1.1754944e-38, %v306_v20  ;;  %vm305_vm13 = vcmp.eq.f32.partialorder %v304_v21, 8.507059e+37 }
 0x528   :  { %v846_v15 = vpop.eup %845 }
 0x529   :  { %v296_v16 = vmul.f32 %v846_v15, %v294_v14  ;;  %vm301_vm10 = vweird.f32 %v846_v15 }
 0x52a   :  { %vm302_vm12 = vmor %vm300_vm11, %vm301_vm10 }
 0x52b   :  { %v297_v17 = vsub.f32 1.0, %v296_v16 }
 0x52d   :  { %v298_v18 = vmul.f32 %v846_v15, %v297_v17 }
 0x52f   :  { %v299_v19 = vadd.f32 %v846_v15, %v298_v18 }
 0x531   :  { %v303_v22 = vsel %vm302_vm12, %v846_v15, %v299_v19 }
 0x532   :  { %v308_v25 = vsel %vm305_vm13, %v307_v23, %v303_v22 }
 0x533   :  { %v311_v27 = vmul.f32 %v308_v25, %v253_v63  ;;  %v100_v63 = vpop.f32.mrf.mxu0 }
 0x534   :  { %v101_v0 = vadd.f32 %v1018_v11, %v100_v63 }
 0x590   :  { %v314_v24 = vpop.permute.xlu0 %313 }
 0x591   :  { %v316_v26 = vmul.f32 %v314_v24, %v308_v25 }
 0x593   :  { %318 = vrot.lane.b32.xlu1 %v316_v26, %s889_s30 }
 0x605   :  { %v319_v28 = vpop.permute.xlu1 %318 }
 0x606   :  { %v321_v29 = vadd.f32 %v319_v28, %v311_v27  ;;  %v685_v27 = vld [vmem:[%s1195_s6 + $0x18] sm:$0xff]  ;;  %v684_v28 = vld [vmem:[%s1195_s6 + $0x10] sm:$0xff] }
 0x607   :  { %816 = vmatpush.msra.mxu3 %v685_v27 }
 0x608   :  { %847 = vtanh.f32 %v321_v29 }
 0x609   :  { %817 = vmatpush.msra.mxu3 %v684_v28 }
 0x60e   :  { %v848_v30 = vpop.eup %847 }
 0x60f   :  { %324 = vrot.lane.b32.xlu2 %v848_v30, %s889_s30  ;;  %v683_v30 = vld [vmem:[%s1195_s6 + $0x8] sm:$0xff] }
 0x610   :  { %818 = vmatpush.msra.mxu3 %v683_v30 }
 0x612   :  { %819 = vmatpush.msra.mxu3 %v682_v31 }
 0x669   :  { %v325_v32 = vpop.permute.xlu2 %324 }
 0x66a   :  { %v327_v33 = vmul.f32 %v325_v32, %v308_v25 }
 0x66c   :  { %329 = vrot.lane.b32.xlu0 %v327_v33, %s890_s2 }
 0x6de   :  { %v330_v34 = vpop.permute.xlu0 %329 }
 0x6df   :  { %333 = vst.msk [vmem:[#allocation3 + $0x10] sm:$0xff] %vm127_vm1, %v330_v34  ;;  %796 = vmatmul.msk.f32.vlgmr.msra.gmra.mxu1 %vm127_vm1, %v330_v34 }
 0x6e0   :  { %726 = vmatpush.msra.mxu1 %v685_v27 }
 0x6e2   :  { %727 = vmatpush.msra.mxu1 %v684_v28 }
 0x6e4   :  { %728 = vmatpush.msra.mxu1 %v683_v30 }
 0x6e6   :  { %729 = vmatpush.msra.mxu1 %v682_v31 }
 0x75c   :  { %v355_v37 = vpop.f32.mrf.mxu1 }
 0x75d   :  { %v358_v38 = vadd.f32 %v355_v37, %v98_v36 }
 0x75f   :  { %849 = vtanh.f32 %v358_v38  ;;  %v797_v40 = vmul.f32 -1.442695, %v358_v38  ;;  %v1103_v38 = vld [vmem:[%s1196_s7] ss:$0 sm:$0xff] }
 0x761   :  { %851 = vpow2.f32 %v797_v40 }
 0x765   :  { %v850_v39 = vpop.eup %849 }
 0x766   :  { %381 = vrot.lane.b32.xlu1 %v850_v39, %s889_s30 }
 0x767   :  { %v852_v41 = vpop.eup %851 }
 0x768   :  { %v362_v42 = vadd.f32 1.0, %v852_v41 }
 0x76a   :  { %853 = vrcp.f32 %v362_v42  ;;  %v374_v48 = vand.u32 2147483648, %v362_v42  ;;  %vm368_vm15 = vweird.f32 %v362_v42  ;;  %v372_v49 = vand.u32 2147483647, %v362_v42 }
 0x76c   :  { %v375_v51 = vor.u32 1.1754944e-38, %v374_v48  ;;  %vm373_vm3 = vcmp.eq.f32.partialorder %v372_v49, 8.507059e+37 }
 0x770   :  { %v854_v43 = vpop.eup %853 }
 0x771   :  { %v364_v44 = vmul.f32 %v854_v43, %v362_v42  ;;  %vm369_vm14 = vweird.f32 %v854_v43 }
 0x772   :  { %vm370_vm2 = vmor %vm368_vm15, %vm369_vm14 }
 0x773   :  { %v365_v45 = vsub.f32 1.0, %v364_v44 }
 0x775   :  { %v366_v46 = vmul.f32 %v854_v43, %v365_v45 }
 0x777   :  { %v367_v47 = vadd.f32 %v854_v43, %v366_v46 }
 0x779   :  { %v371_v50 = vsel %vm370_vm2, %v854_v43, %v367_v47 }
 0x77a   :  { %v376_v53 = vsel %vm373_vm3, %v375_v51, %v371_v50 }
 0x77b   :  { %v379_v55 = vmul.f32 %v376_v53, %v321_v29  ;;  %v37_v29 = vld [vmem:[%s1190_s0 + $0x28] sm:$0xff] }
 0x77c   :  { %787 = vmatmul.msk.f32.gmra.mxu0 %vm46_vm0, %v37_v29 }
 0x784   :  { %788 = vmatmul.msk.f32.gmra.mxu0 %vm46_vm0, %v38_v61 }
 0x7d8   :  { %v382_v52 = vpop.permute.xlu1 %381 }
 0x7d9   :  { %v384_v54 = vmul.f32 %v382_v52, %v376_v53 }
 0x7db   :  { %386 = vrot.lane.b32.xlu2 %v384_v54, %s889_s30 }
 0x7f9   :  { %v103_v34 = vpop.f32.mrf.mxu0 }
 0x7fa   :  { %v104_v35 = vadd.f32 %v1018_v11, %v103_v34 }
 0x835   :  { %v387_v56 = vpop.permute.xlu2 %386 }
 0x836   :  { %v389_v57 = vadd.f32 %v387_v56, %v379_v55 }
 0x838   :  { %855 = vtanh.f32 %v389_v57 }
 0x83e   :  { %v856_v58 = vpop.eup %855 }
 0x83f   :  { %392 = vrot.lane.b32.xlu0 %v856_v58, %s889_s30 }
 0x8b1   :  { %v393_v59 = vpop.permute.xlu0 %392 }
 0x8b2   :  { %v395_v60 = vmul.f32 %v393_v59, %v376_v53 }
 0x8b4   :  { %397 = vrot.lane.b32.xlu1 %v395_v60, %s890_s2 }
 0x926   :  { %v398_v62 = vpop.permute.xlu1 %397 }
 0x927   :  { %401 = vst.msk [vmem:[#allocation3 + $0x18] sm:$0xff] %vm127_vm1, %v398_v62  ;;  %798 = vmatmul.msk.f32.vlgmr.msrb.gmra.mxu2 %vm127_vm1, %v398_v62 }
 0x9aa   :  { %v423_v1 = vpop.f32.mrf.mxu2 }
 0x9ab   :  { %v426_v2 = vadd.f32 %v423_v1, %v101_v0  ;;  %v674_v1 = vld [vmem:[#allocation3] sm:$0xff] }
 0x9ad   :  { %857 = vtanh.f32 %v426_v2  ;;  %v799_v4 = vmul.f32 -1.442695, %v426_v2 }
 0x9af   :  { %859 = vpow2.f32 %v799_v4  ;;  %v676_v4 = vld [vmem:[#allocation3 + $0x10] sm:$0xff] }
 0x9b3   :  { %v858_v3 = vpop.eup %857 }
 0x9b4   :  { %449 = vrot.lane.b32.xlu2 %v858_v3, %s889_s30  ;;  %v675_v3 = vld [vmem:[#allocation3 + $0x8] sm:$0xff] }
 0x9b5   :  { %v860_v5 = vpop.eup %859 }
 0x9b6   :  { %v430_v6 = vadd.f32 1.0, %v860_v5  ;;  %v677_v5 = vld [vmem:[#allocation3 + $0x18] sm:$0xff] }
 0x9b8   :  { %861 = vrcp.f32 %v430_v6  ;;  %v442_v14 = vand.u32 2147483648, %v430_v6  ;;  %vm436_vm5 = vweird.f32 %v430_v6  ;;  %v440_v15 = vand.u32 2147483647, %v430_v6 }
 0x9ba   :  { %v443_v17 = vor.u32 1.1754944e-38, %v442_v14  ;;  %vm441_vm7 = vcmp.eq.f32.partialorder %v440_v15, 8.507059e+37 }
 0x9be   :  { %v862_v7 = vpop.eup %861 }
 0x9bf   :  { %v432_v8 = vmul.f32 %v862_v7, %v430_v6  ;;  %vm437_vm4 = vweird.f32 %v862_v7  ;;  %v106_v6 = vpop.f32.mrf.mxu0 }
 0x9c0   :  { %vm438_vm6 = vmor %vm436_vm5, %vm437_vm4 }
 0x9c1   :  { %v433_v10 = vsub.f32 1.0, %v432_v8 }
 0x9c3   :  { %v434_v12 = vmul.f32 %v862_v7, %v433_v10 }
 0x9c5   :  { %v435_v13 = vadd.f32 %v862_v7, %v434_v12 }
 0x9c7   :  { %v439_v16 = vsel %vm438_vm6, %v862_v7, %v435_v13  ;;  %v107_v7 = vadd.f32 %v1018_v11, %v106_v6 }
 0x9c8   :  { %v444_v19 = vsel %vm441_vm7, %v443_v17, %v439_v16 }
 0x9c9   :  { %v447_v21 = vmul.f32 %v444_v19, %v389_v57 }
 0xa0e   :  { %v450_v18 = vpop.permute.xlu2 %449 }
 0xa0f   :  { %v452_v20 = vmul.f32 %v450_v18, %v444_v19 }
 0xa11   :  { %454 = vrot.lane.b32.xlu0 %v452_v20, %s889_s30 }
 0xa83   :  { %v455_v22 = vpop.permute.xlu0 %454 }
 0xa84   :  { %v1075_v23 = vadd.f32 %v455_v22, %v447_v21 }
 0xa86   :  { %863 = vtanh.f32 %v1075_v23 }
 0xa8c   :  { %v864_v24 = vpop.eup %863 }
 0xa8d   :  { %460 = vrot.lane.b32.xlu1 %v864_v24, %s889_s30 }
 0xaff   :  { %v461_v25 = vpop.permute.xlu1 %460 }
 0xb00   :  { %v463_v26 = vmul.f32 %v461_v25, %v444_v19 }
 0xb02   :  { %465 = vrot.lane.b32.xlu2 %v463_v26, %s890_s2 }
 0xb5c   :  { %v466_v32 = vpop.permute.xlu2 %465 }
 0xb5d   :  { %469 = vst.msk [vmem:[#allocation3 + $0x20] sm:$0xff] %vm127_vm1, %v466_v32  ;;  %800 = vmatmul.msk.f32.vlgmr.msrb.gmra.mxu3 %vm127_vm1, %v466_v32 }
 0xb64   :  { %v678_v33 = vld [vmem:[#allocation3 + $0x20] sm:$0xff] }
 0xb65   :  { %810 = vmatmul.msk.f32.vlgmr.msra.gmra.mxu3 %vm127_vm1, %v678_v33 }
 0xbe0   :  { %v491_v36 = vpop.f32.mrf.mxu3 }
 0xbe1   :  { %v494_v37 = vadd.f32 %v491_v36, %v104_v35 }
 0xbe3   :  { %865 = vtanh.f32 %v494_v37  ;;  %v801_v42 = vmul.f32 -1.442695, %v494_v37 }
 0xbe5   :  { %867 = vpow2.f32 %v801_v42 }
 0xbe8   :  { %v743_v39 = vpop.f32.mrf.mxu3 }
 0xbe9   :  { %v866_v40 = vpop.eup %865  ;;  %v744_v41 = vadd.f32 %v1103_v38, %v743_v39 }
 0xbea   :  { %517 = vrot.lane.b32.xlu0 %v866_v40, %s889_s30 }
 0xbeb   :  { %760 = vst.msk [vmem:[%s1197_s8 + $0x20] sm:$0xff] %vm755_vm8, %v744_v41  ;;  %v868_v43 = vpop.eup %867 }
 0xbec   :  { %v498_v44 = vadd.f32 1.0, %v868_v43 }
 0xbee   :  { %869 = vrcp.f32 %v498_v44  ;;  %v510_v50 = vand.u32 2147483648, %v498_v44  ;;  %vm504_vm10 = vweird.f32 %v498_v44  ;;  %v508_v51 = vand.u32 2147483647, %v498_v44 }
 0xbf0   :  { %v511_v53 = vor.u32 1.1754944e-38, %v510_v50  ;;  %vm509_vm12 = vcmp.eq.f32.partialorder %v508_v51, 8.507059e+37 }
 0xbf4   :  { %v870_v45 = vpop.eup %869 }
 0xbf5   :  { %v500_v46 = vmul.f32 %v870_v45, %v498_v44  ;;  %vm505_vm9 = vweird.f32 %v870_v45 }
 0xbf6   :  { %vm506_vm11 = vmor %vm504_vm10, %vm505_vm9 }
 0xbf7   :  { %v501_v47 = vsub.f32 1.0, %v500_v46 }
 0xbf9   :  { %v502_v48 = vmul.f32 %v870_v45, %v501_v47  ;;  %v110_v47 = vadd.f32 %v1018_v11, %v1013_v9 }
 0xbfb   :  { %v503_v49 = vadd.f32 %v870_v45, %v502_v48 }
 0xbfd   :  { %v507_v52 = vsel %vm506_vm11, %v870_v45, %v503_v49 }
 0xbfe   :  { %v512_v55 = vsel %vm509_vm12, %v511_v53, %v507_v52 }
 0xbff   :  { %v515_v57 = vmul.f32 %v512_v55, %v1075_v23 }
 0xc5c   :  { %v518_v54 = vpop.permute.xlu0 %517 }
 0xc5d   :  { %v520_v56 = vmul.f32 %v518_v54, %v512_v55 }
 0xc5f   :  { %522 = vrot.lane.b32.xlu1 %v520_v56, %s889_s30 }
 0xcd1   :  { %v523_v58 = vpop.permute.xlu1 %522 }
 0xcd2   :  { %v1113_v59 = vadd.f32 %v523_v58, %v515_v57 }
 0xcd4   :  { %871 = vtanh.f32 %v1113_v59 }
 0xcda   :  { %v872_v60 = vpop.eup %871 }
 0xcdb   :  { %528 = vrot.lane.b32.xlu2 %v872_v60, %s889_s30 }
 0xd35   :  { %v529_v62 = vpop.permute.xlu2 %528 }
 0xd36   :  { %v531_v63 = vmul.f32 %v529_v62, %v512_v55 }
 0xd38   :  { %533 = vrot.lane.b32.xlu0 %v531_v63, %s890_s2 }
 0xdaa   :  { %v534_v0 = vpop.permute.xlu0 %533 }
 0xdab   :  { %537 = vst.msk [vmem:[#allocation3 + $0x28] sm:$0xff] %vm127_vm1, %v534_v0  ;;  %802 = vmatmul.msk.f32.vlgmr.msrb.gmra.mxu1 %vm127_vm1, %v534_v0 }
 0xdb2   :  { %v679_v2 = vld [vmem:[#allocation3 + $0x28] sm:$0xff] }
 0xdb3   :  { %806 = vmatmul.msk.f32.vlgmr.msra.gmra.mxu1 %vm127_vm1, %v674_v1  ;;  %811 = vmatmul.msk.f32.gmra.mxu3 %vm127_vm1, %v679_v2 }
 0xdbb   :  { %807 = vmatmul.msk.f32.gmra.mxu1 %vm127_vm1, %v675_v3 }
 0xdc3   :  { %808 = vmatmul.msk.f32.gmra.mxu1 %vm127_vm1, %v676_v4 }
 0xdcb   :  { %809 = vmatmul.msk.f32.gmra.mxu1 %vm127_vm1, %v677_v5 }
 0xe28   :  { %v559_v8 = vpop.f32.mrf.mxu1 }
 0xe29   :  { %v562_v10 = vadd.f32 %v559_v8, %v107_v7 }
 0xe2b   :  { %873 = vtanh.f32 %v562_v10  ;;  %v803_v23 = vmul.f32 -1.442695, %v562_v10 }
 0xe2d   :  { %875 = vpow2.f32 %v803_v23 }
 0xe30   :  { %v731_v12 = vpop.f32.mrf.mxu1 }
 0xe31   :  { %v874_v13 = vpop.eup %873  ;;  %v732_v14 = vadd.f32 %v1103_v38, %v731_v12 }
 0xe32   :  { %585 = vrot.lane.b32.xlu1 %v874_v13, %s889_s30 }
 0xe33   :  { %756 = vst.msk [vmem:[%s1197_s8] sm:$0xff] %vm755_vm8, %v732_v14  ;;  %v876_v24 = vpop.eup %875 }
 0xe34   :  { %v566_v25 = vadd.f32 1.0, %v876_v24 }
 0xe36   :  { %v746_v15 = vpop.f32.mrf.mxu3  ;;  %877 = vrcp.f32 %v566_v25  ;;  %v578_v31 = vand.u32 2147483648, %v566_v25  ;;  %vm572_vm13 = vweird.f32 %v566_v25  ;;  %v576_v32 = vand.u32 2147483647, %v566_v25 }
 0xe37   :  { %v747_v16 = vadd.f32 %v1103_v38, %v746_v15 }
 0xe38   :  { %v734_v17 = vpop.f32.mrf.mxu1  ;;  %v579_v34 = vor.u32 1.1754944e-38, %v578_v31  ;;  %vm577_vm15 = vcmp.eq.f32.partialorder %v576_v32, 8.507059e+37 }
 0xe39   :  { %761 = vst.msk [vmem:[%s1197_s8 + $0x28] sm:$0xff] %vm755_vm8, %v747_v16  ;;  %v735_v18 = vadd.f32 %v1103_v38, %v734_v17 }
 0xe3b   :  { %757 = vst.msk [vmem:[%s1197_s8 + $0x8] sm:$0xff] %vm755_vm8, %v735_v18 }
 0xe3c   :  { %v878_v26 = vpop.eup %877 }
 0xe3d   :  { %v568_v27 = vmul.f32 %v878_v26, %v566_v25  ;;  %vm573_vm0 = vweird.f32 %v878_v26 }
 0xe3e   :  { %vm574_vm14 = vmor %vm572_vm13, %vm573_vm0 }
 0xe3f   :  { %v569_v28 = vsub.f32 1.0, %v568_v27 }
 0xe40   :  { %v737_v19 = vpop.f32.mrf.mxu1 }
 0xe41   :  { %v738_v20 = vadd.f32 %v1103_v38, %v737_v19  ;;  %v570_v29 = vmul.f32 %v878_v26, %v569_v28 }
 0xe43   :  { %758 = vst.msk [vmem:[%s1197_s8 + $0x10] sm:$0xff] %vm755_vm8, %v738_v20  ;;  %v571_v30 = vadd.f32 %v878_v26, %v570_v29 }
 0xe45   :  { %v575_v33 = vsel %vm574_vm14, %v878_v26, %v571_v30 }
 0xe46   :  { %v580_v36 = vsel %vm577_vm15, %v579_v34, %v575_v33 }
 0xe47   :  { %v583_v39 = vmul.f32 %v580_v36, %v1113_v59 }
 0xe48   :  { %v740_v21 = vpop.f32.mrf.mxu1 }
 0xe49   :  { %v741_v22 = vadd.f32 %v1103_v38, %v740_v21 }
 0xe4b   :  { %759 = vst.msk [vmem:[%s1197_s8 + $0x18] sm:$0xff] %vm755_vm8, %v741_v22 }
 0xea4   :  { %v586_v35 = vpop.permute.xlu1 %585 }
 0xea5   :  { %v588_v37 = vmul.f32 %v586_v35, %v580_v36 }
 0xea7   :  { %590 = vrot.lane.b32.xlu2 %v588_v37, %s889_s30 }
 0xf01   :  { %v591_v40 = vpop.permute.xlu2 %590 }
 0xf02   :  { %v593_v41 = vadd.f32 %v591_v40, %v583_v39 }
 0xf04   :  { %879 = vtanh.f32 %v593_v41 }
 0xf0a   :  { %v880_v42 = vpop.eup %879 }
 0xf0b   :  { %596 = vrot.lane.b32.xlu0 %v880_v42, %s889_s30 }
 0xf7d   :  { %v597_v43 = vpop.permute.xlu0 %596 }
 0xf7e   :  { %v599_v44 = vmul.f32 %v597_v43, %v580_v36 }
 0xf80   :  { %601 = vrot.lane.b32.xlu1 %v599_v44, %s890_s2 }
 0xff2   :  { %v602_v45 = vpop.permute.xlu1 %601 }
 0xff3   :  { %605 = vst.msk [vmem:[#allocation3 + $0x30] sm:$0xff] %vm127_vm1, %v602_v45  ;;  %804 = vmatmul.msk.f32.vlgmr.msra.gmra.mxu2 %vm127_vm1, %v602_v45 }
 0xffa   :  { %v680_v46 = vld [vmem:[#allocation3 + $0x30] sm:$0xff] }
 0xffb   :  { %812 = vmatmul.msk.f32.gmra.mxu3 %vm127_vm1, %v680_v46 }
0x1076   :  { %v627_v48 = vpop.f32.mrf.mxu2 }
0x1077   :  { %v630_v49 = vadd.f32 %v627_v48, %v110_v47 }
0x1079   :  { %881 = vtanh.f32 %v630_v49  ;;  %v805_v53 = vmul.f32 -1.442695, %v630_v49 }
0x107b   :  { %883 = vpow2.f32 %v805_v53 }
0x107e   :  { %v749_v50 = vpop.f32.mrf.mxu3 }
0x107f   :  { %v882_v51 = vpop.eup %881  ;;  %v750_v52 = vadd.f32 %v1103_v38, %v749_v50 }
0x1080   :  { %653 = vrot.lane.b32.xlu2 %v882_v51, %s889_s30 }
0x1081   :  { %762 = vst.msk [vmem:[%s1197_s8 + $0x30] sm:$0xff] %vm755_vm8, %v750_v52  ;;  %v884_v54 = vpop.eup %883 }
0x1082   :  { %v634_v55 = vadd.f32 1.0, %v884_v54 }
0x1084   :  { %885 = vrcp.f32 %v634_v55  ;;  %v646_v59 = vand.u32 2147483648, %v634_v55  ;;  %vm640_vm3 = vweird.f32 %v634_v55  ;;  %v644_v60 = vand.u32 2147483647, %v634_v55 }
0x1086   :  { %v647_v62 = vor.u32 1.1754944e-38, %v646_v59  ;;  %vm645_vm5 = vcmp.eq.f32.partialorder %v644_v60, 8.507059e+37 }
0x108a   :  { %v886_v9 = vpop.eup %885 }
0x108b   :  { %v636_v11 = vmul.f32 %v886_v9, %v634_v55  ;;  %vm641_vm2 = vweird.f32 %v886_v9 }
0x108c   :  { %vm642_vm4 = vmor %vm640_vm3, %vm641_vm2 }
0x108d   :  { %v637_v56 = vsub.f32 1.0, %v636_v11 }
0x108f   :  { %v638_v57 = vmul.f32 %v886_v9, %v637_v56 }
0x1091   :  { %v639_v58 = vadd.f32 %v886_v9, %v638_v57 }
0x1093   :  { %v643_v61 = vsel %vm642_vm4, %v886_v9, %v639_v58 }
0x1094   :  { %v648_v0 = vsel %vm645_vm5, %v647_v62, %v643_v61 }
0x1095   :  { %v651_v2 = vmul.f32 %v648_v0, %v593_v41 }
0x10da   :  { %v654_v63 = vpop.permute.xlu2 %653 }
0x10db   :  { %v656_v1 = vmul.f32 %v654_v63, %v648_v0 }
0x10dd   :  { %658 = vrot.lane.b32.xlu0 %v656_v1, %s889_s30 }
0x114f   :  { %v659_v3 = vpop.permute.xlu0 %658 }
0x1150   :  { %v661_v4 = vadd.f32 %v659_v3, %v651_v2 }
0x1152   :  { %887 = vtanh.f32 %v661_v4  ;;  %766 = vrot.lane.b32.xlu0 %v661_v4, %s891_s22 }
0x1158   :  { %v888_v5 = vpop.eup %887 }
0x1159   :  { %664 = vrot.lane.b32.xlu1 %v888_v5, %s889_s30 }
0x11c4   :  { %v767_v6 = vpop.permute.xlu0 %766 }
0x11c5   :  { %769 = vst.msk [vmem:[%s1198_s10] sm:$0xff] %vm127_vm1, %v767_v6 }
0x11cb   :  { %v665_v7 = vpop.permute.xlu1 %664 }
0x11cc   :  { %v667_v8 = vmul.f32 %v665_v7, %v648_v0 }
0x11ce   :  { %669 = vrot.lane.b32.xlu2 %v667_v8, %s890_s2 }
0x1228   :  { %v670_v10 = vpop.permute.xlu2 %669 }
0x1229   :  { %673 = vst.msk [vmem:[#allocation3 + $0x38] sm:$0xff] %vm127_vm1, %v670_v10 }
0x122a   :  { %764 = vst.msk [vmem:[%s1199_s9] sm:$0xff] %vm127_vm1, %v670_v10 }
0x1230   :  { %v681_v12 = vld [vmem:[#allocation3 + $0x38] sm:$0xff] }
0x1231   :  { %813 = vmatmul.msk.f32.gmra.mxu3 %vm127_vm1, %v681_v12 }
0x12b4   :  { %v752_v13 = vpop.f32.mrf.mxu3 }
0x12b5   :  { %v753_v14 = vadd.f32 %v1103_v38, %v752_v13 }
0x12b7   :  { %763 = vst.msk [vmem:[%s1197_s8 + $0x38] sm:$0xff] %vm755_vm8, %v753_v14 }

</bundles_post_ra>
